<compile_context>
chip_gen: v5e
topology: v5e:2x2
jax: 0.10.0
libtpu: 0.0.40
codegen_flags: <defaults>
</compile_context>

<pallas_src>
import functools

import jax
import jax.numpy as jnp
from jax.experimental import pallas as pl
from jax.experimental.pallas import tpu as pltpu


def _round_up(n, m):
    return ((n + m - 1) // m) * m


def _beta_vae_kernel(
    x_ref, eps_ref,
    w1_ref, b1_ref, w2_ref, b2_ref,
    wml_ref, bml_ref,                         # fused [mu ; logvar] head
    dw1_ref, db1_ref, dw2_ref, db2_ref, dw3_ref, db3_ref,
    recon_ref, mulv_ref,
):
    latent = eps_ref.shape[0]
    mxu_dtype = w1_ref.dtype                  # bf16 weights -> bf16 MXU path

    def dense(w_ref, a, b_ref):
        # (out, in) @ (in, tile_b) -> (out, tile_b); bf16 MXU inputs, f32
        # accumulation, f32 bias broadcast along the (batch) lane axis.
        return jnp.dot(w_ref[...], a.astype(mxu_dtype),
                       preferred_element_type=jnp.float32) + b_ref[...]

    x = x_ref[...]                            # (input_dim, tile_b), bf16

    # --- encoder: Linear -> ReLU -> (Dropout = identity), twice ---
    h = jnp.maximum(dense(w1_ref, x, b1_ref), 0.0)
    h = jnp.maximum(dense(w2_ref, h, b2_ref), 0.0)

    # --- fused latent heads: one matmul produces [mu ; logvar] ---
    mulv = dense(wml_ref, h, bml_ref)         # (2*latent, tile_b), f32
    mu = mulv[:latent, :]
    logvar = mulv[latent:, :]

    # --- reparameterization trick (f32 elementwise / EUP exp, lane-dense) ---
    std = jnp.exp(0.5 * logvar)
    z = mu + eps_ref[...] * std

    # --- decoder: Linear -> ReLU -> (Dropout = identity), twice, then Linear ---
    d = jnp.maximum(dense(dw1_ref, z, db1_ref), 0.0)
    d = jnp.maximum(dense(dw2_ref, d, db2_ref), 0.0)
    recon = dense(dw3_ref, d, db3_ref)

    recon_ref[...] = recon.astype(recon_ref.dtype)
    mulv_ref[...] = mulv.astype(mulv_ref.dtype)


@functools.partial(jax.jit, static_argnames=("tile_b",))
def beta_vae_forward(x, eps, packed, tile_b=1024):
    """Batch-tiled (batch-on-lanes) Pallas forward. Returns (recon_x, mu, logvar)."""
    batch, input_dim = x.shape
    latent_dim = eps.shape[1]
    h1 = packed["w1"].shape[0]
    h2 = packed["w2"].shape[0]

    # --- lane-dense batch tiling ---------------------------------------
    # Tile must be a multiple of 128 (lane width).  Cap it at ~half the
    # 128-rounded batch so the grid keeps >= 2 steps whenever possible and
    # v7x megacore ("parallel" axis) can split the work across both TCs.
    tb = max(128, (int(tile_b) // 128) * 128)
    half = max(128, _round_up(pl.cdiv(batch, 2), 128))
    tb = min(tb, half)
    padded = _round_up(batch, tb)
    pad = padded - batch
    grid = (padded // tb,)

    # Batch-on-lanes relayout: (B, F) -> (F, padded_B).  The zero-pad fuses
    # into this transpose copy, so no separate padded HBM round trip.
    # x feeds bf16 matmuls -> cast at the boundary (halves its HBM stream).
    x_t = jnp.pad(x, ((0, pad), (0, 0))).T.astype(jnp.bfloat16)   # (input_dim, padded)
    eps_t = jnp.pad(eps, ((0, pad), (0, 0))).T                    # (latent, padded) f32

    def act_spec(feat):
        # (features, tile_b) block: sublane dim == full feature dim, lane dim
        # a multiple of 128 -> satisfies the (8,128) rule and gives unmasked,
        # lane-dense loads/stores.
        return pl.BlockSpec((feat, tb), lambda i: (0, i))

    def resident_spec(arr):
        # Full-array block with a constant index map: fetched once, then
        # VMEM-resident for every grid step.
        return pl.BlockSpec(arr.shape, lambda i: (0, 0))

    # --- advisory cost estimate so XLA can overlap surrounding ops ---
    layer_dims = [(input_dim, h1), (h1, h2), (h2, 2 * latent_dim),
                  (latent_dim, h2), (h2, h1), (h1, input_dim)]
    flops = 2 * padded * sum(a * b for a, b in layer_dims)
    weight_bytes = sum(int(v.size) * v.dtype.itemsize for v in packed.values())
    act_bytes = padded * (2 * input_dim                 # x bf16 in
                          + 4 * latent_dim              # eps f32 in
                          + 4 * (input_dim + 2 * latent_dim))  # recon + mu|logvar out
    cost = pl.CostEstimate(flops=flops,
                           transcendentals=padded * latent_dim,
                           bytes_accessed=weight_bytes + act_bytes)

    recon_t, mulv_t = pl.pallas_call(
        _beta_vae_kernel,
        grid=grid,
        in_specs=[
            act_spec(input_dim), act_spec(latent_dim),
            resident_spec(packed["w1"]), resident_spec(packed["b1"]),
            resident_spec(packed["w2"]), resident_spec(packed["b2"]),
            resident_spec(packed["wml"]), resident_spec(packed["bml"]),
            resident_spec(packed["dw1"]), resident_spec(packed["db1"]),
            resident_spec(packed["dw2"]), resident_spec(packed["db2"]),
            resident_spec(packed["dw3"]), resident_spec(packed["db3"]),
        ],
        out_specs=(act_spec(input_dim), act_spec(2 * latent_dim)),
        out_shape=(
            jax.ShapeDtypeStruct((input_dim, padded), jnp.float32),       # recon^T
            jax.ShapeDtypeStruct((2 * latent_dim, padded), jnp.float32),  # [mu;logvar]^T
        ),
        compiler_params=pltpu.CompilerParams(
            # Parallel batch axis -> v7x megacore sharding; no-op on v5e/v6e.
            # Total VMEM use is << scoped defaults on all generations, so no
            # tile shrinking is needed anywhere (v7x included).
            dimension_semantics=("parallel",),
        ),
        cost_estimate=cost,
    )(
        x_t, eps_t,
        packed["w1"], packed["b1"], packed["w2"], packed["b2"],
        packed["wml"], packed["bml"],
        packed["dw1"], packed["db1"], packed["dw2"], packed["db2"],
        packed["dw3"], packed["db3"],
    )

    recon = recon_t[:, :batch].T
    mu = mulv_t[:latent_dim, :batch].T
    logvar = mulv_t[latent_dim:, :batch].T
    return recon, mu, logvar


def init_params(key, input_dim, hidden_dims, latent_dim):
    """Deterministic synthetic params in PyTorch nn.Linear layout: W (out, in), b (out,)."""
    def linear(k, fan_in, fan_out):
        kw, kb = jax.random.split(k)
        bound = 1.0 / jnp.sqrt(fan_in)
        w = jax.random.uniform(kw, (fan_out, fan_in), jnp.float32, -bound, bound)
        b = jax.random.uniform(kb, (fan_out,), jnp.float32, -bound, bound)
        return w, b

    keys = jax.random.split(key, 7)
    h1, h2 = hidden_dims
    p = {}
    p["w1"], p["b1"] = linear(keys[0], input_dim, h1)
    p["w2"], p["b2"] = linear(keys[1], h1, h2)
    p["wmu"], p["bmu"] = linear(keys[2], h2, latent_dim)
    p["wlv"], p["blv"] = linear(keys[3], h2, latent_dim)
    # decoder: latent -> reversed(hidden_dims) -> input_dim
    p["dw1"], p["db1"] = linear(keys[4], latent_dim, h2)
    p["dw2"], p["db2"] = linear(keys[5], h2, h1)
    p["dw3"], p["db3"] = linear(keys[6], h1, input_dim)
    return p


def pack_params(p, weight_dtype=jnp.bfloat16):
    """Fuse mu/logvar heads, cast weights to the MXU dtype (bf16).

    Weights stay (out, in); biases become f32 column vectors (out, 1) so they
    broadcast along the lane (batch) axis inside the kernel."""
    def col(b):
        return b.reshape(-1, 1).astype(jnp.float32)

    return {
        "w1": p["w1"].astype(weight_dtype), "b1": col(p["b1"]),
        "w2": p["w2"].astype(weight_dtype), "b2": col(p["b2"]),
        "wml": jnp.concatenate([p["wmu"], p["wlv"]], axis=0).astype(weight_dtype),
        "bml": col(jnp.concatenate([p["bmu"], p["blv"]], axis=0)),
        "dw1": p["dw1"].astype(weight_dtype), "db1": col(p["db1"]),
        "dw2": p["dw2"].astype(weight_dtype), "db2": col(p["db2"]),
        "dw3": p["dw3"].astype(weight_dtype), "db3": col(p["db3"]),
    }


def beta_vae_reference(x, eps, packed):
    """Pure-JAX reference with identical (bf16-weight, f32-accum) math, (B, F) layout."""
    def dense(a, w, b):
        return jnp.dot(a.astype(w.dtype), w.T,
                       preferred_element_type=jnp.float32) + b.T

    latent = eps.shape[1]
    h = jnp.maximum(dense(x, packed["w1"], packed["b1"]), 0.0)
    h = jnp.maximum(dense(h, packed["w2"], packed["b2"]), 0.0)
    mulv = dense(h, packed["wml"], packed["bml"])
    mu, logvar = mulv[:, :latent], mulv[:, latent:]
    z = mu + eps * jnp.exp(0.5 * logvar)
    d = jnp.maximum(dense(z, packed["dw1"], packed["db1"]), 0.0)
    d = jnp.maximum(dense(d, packed["dw2"], packed["db2"]), 0.0)
    recon = dense(d, packed["dw3"], packed["db3"])
    return recon, mu, logvar


if __name__ == "__main__":
    input_dim = 16
    hidden_dims = (32, 32)
    latent_dim = 8
    batch = 200          # not a tile multiple -> exercises padding + 2-step grid

    key = jax.random.PRNGKey(0)
    kx, keps, kp = jax.random.split(key, 3)

    x = jax.random.normal(kx, (batch, input_dim), jnp.float32)
    eps = jax.random.normal(keps, (batch, latent_dim), jnp.float32)  # ~ randn_like(std)
    params = init_params(kp, input_dim, hidden_dims, latent_dim)
    packed = pack_params(params)

    recon, mu, logvar = beta_vae_forward(x, eps, packed, tile_b=1024)
    jax.block_until_ready((recon, mu, logvar))

    assert recon.shape == (batch, input_dim)
    assert mu.shape == (batch, latent_dim)
    assert logvar.shape == (batch, latent_dim)

    # Correctness check against a pure-JAX reference using the same math.
    r_ref, mu_ref, lv_ref = beta_vae_reference(x, eps, packed)
    assert jnp.allclose(recon, r_ref, atol=1e-2, rtol=1e-2)
    assert jnp.allclose(mu, mu_ref, atol=1e-2, rtol=1e-2)
    assert jnp.allclose(logvar, lv_ref, atol=1e-2, rtol=1e-2)

    print("KERNEL_OK")
</pallas_src>

<mosaic_0001>
module attributes {stable_mosaic.version = 11 : i64} {
  func.func @_beta_vae_kernel(%arg0: i32, %arg1: memref<16x128xbf16, #tpu.memory_space<vmem>>, %arg2: memref<8x128xf32, #tpu.memory_space<vmem>>, %arg3: memref<32x16xbf16, #tpu.memory_space<vmem>>, %arg4: memref<32x1xf32, #tpu.memory_space<vmem>>, %arg5: memref<32x32xbf16, #tpu.memory_space<vmem>>, %arg6: memref<32x1xf32, #tpu.memory_space<vmem>>, %arg7: memref<16x32xbf16, #tpu.memory_space<vmem>>, %arg8: memref<16x1xf32, #tpu.memory_space<vmem>>, %arg9: memref<32x8xbf16, #tpu.memory_space<vmem>>, %arg10: memref<32x1xf32, #tpu.memory_space<vmem>>, %arg11: memref<32x32xbf16, #tpu.memory_space<vmem>>, %arg12: memref<32x1xf32, #tpu.memory_space<vmem>>, %arg13: memref<16x32xbf16, #tpu.memory_space<vmem>>, %arg14: memref<16x1xf32, #tpu.memory_space<vmem>>, %arg15: memref<16x128xf32, #tpu.memory_space<vmem>>, %arg16: memref<16x128xf32, #tpu.memory_space<vmem>>) attributes {dimension_semantics = [#tpu.dimension_semantics<parallel>], iteration_bounds = array<i64: 2>, scalar_prefetch = 0 : i64, scratch_operands = 0 : i64, tpu.core_type = #tpu.core_type<tc>, window_params = [{transform_indices = @transform_0, window_bounds = array<i64: 16, 128>}, {transform_indices = @transform_1, window_bounds = array<i64: 8, 128>}, {pipeline_mode = #tpu.pipeline_mode<synchronous>, transform_indices = @transform_2, window_bounds = array<i64: 32, 16>}, {pipeline_mode = #tpu.pipeline_mode<synchronous>, transform_indices = @transform_3, window_bounds = array<i64: 32, 1>}, {pipeline_mode = #tpu.pipeline_mode<synchronous>, transform_indices = @transform_4, window_bounds = array<i64: 32, 32>}, {pipeline_mode = #tpu.pipeline_mode<synchronous>, transform_indices = @transform_5, window_bounds = array<i64: 32, 1>}, {pipeline_mode = #tpu.pipeline_mode<synchronous>, transform_indices = @transform_6, window_bounds = array<i64: 16, 32>}, {pipeline_mode = #tpu.pipeline_mode<synchronous>, transform_indices = @transform_7, window_bounds = array<i64: 16, 1>}, {pipeline_mode = #tpu.pipeline_mode<synchronous>, transform_indices = @transform_8, window_bounds = array<i64: 32, 8>}, {pipeline_mode = #tpu.pipeline_mode<synchronous>, transform_indices = @transform_9, window_bounds = array<i64: 32, 1>}, {pipeline_mode = #tpu.pipeline_mode<synchronous>, transform_indices = @transform_10, window_bounds = array<i64: 32, 32>}, {pipeline_mode = #tpu.pipeline_mode<synchronous>, transform_indices = @transform_11, window_bounds = array<i64: 32, 1>}, {pipeline_mode = #tpu.pipeline_mode<synchronous>, transform_indices = @transform_12, window_bounds = array<i64: 16, 32>}, {pipeline_mode = #tpu.pipeline_mode<synchronous>, transform_indices = @transform_13, window_bounds = array<i64: 16, 1>}, {transform_indices = @transform_14, window_bounds = array<i64: 16, 128>}, {transform_indices = @transform_15, window_bounds = array<i64: 16, 128>}]} {
    %c0 = arith.constant 0 : index
    %c0_0 = arith.constant 0 : index
    %0 = vector.load %arg1[%c0, %c0_0] : memref<16x128xbf16, #tpu.memory_space<vmem>>, vector<16x128xbf16>
    %c0_1 = arith.constant 0 : index
    %c0_2 = arith.constant 0 : index
    %1 = vector.load %arg3[%c0_1, %c0_2] : memref<32x16xbf16, #tpu.memory_space<vmem>>, vector<32x16xbf16>
    %cst = arith.constant dense<0.000000e+00> : vector<32x128xf32>
    %2 = tpu.matmul %1, %0, %cst {dimension_numbers = #tpu.dot_dimension_numbers<[1], [0], [0], [1], [0, 0, 1, 1], [], []>} : vector<32x16xbf16>, vector<16x128xbf16>, vector<32x128xf32> -> vector<32x128xf32>
    %c0_3 = arith.constant 0 : index
    %c0_4 = arith.constant 0 : index
    %3 = vector.load %arg4[%c0_3, %c0_4] : memref<32x1xf32, #tpu.memory_space<vmem>>, vector<32x1xf32>
    %4 = vector.broadcast %3 : vector<32x1xf32> to vector<32x128xf32>
    %5 = arith.addf %2, %4 : vector<32x128xf32>
    %cst_5 = arith.constant 0.000000e+00 : f32
    %6 = vector.broadcast %cst_5 : f32 to vector<32x128xf32>
    %7 = arith.maximumf %5, %6 : vector<32x128xf32>
    %c0_6 = arith.constant 0 : index
    %c0_7 = arith.constant 0 : index
    %8 = vector.load %arg5[%c0_6, %c0_7] : memref<32x32xbf16, #tpu.memory_space<vmem>>, vector<32x32xbf16>
    %9 = arith.truncf %7 : vector<32x128xf32> to vector<32x128xbf16>
    %cst_8 = arith.constant dense<0.000000e+00> : vector<32x128xf32>
    %10 = tpu.matmul %8, %9, %cst_8 {dimension_numbers = #tpu.dot_dimension_numbers<[1], [0], [0], [1], [0, 0, 1, 1], [], []>} : vector<32x32xbf16>, vector<32x128xbf16>, vector<32x128xf32> -> vector<32x128xf32>
    %c0_9 = arith.constant 0 : index
    %c0_10 = arith.constant 0 : index
    %11 = vector.load %arg6[%c0_9, %c0_10] : memref<32x1xf32, #tpu.memory_space<vmem>>, vector<32x1xf32>
    %12 = vector.broadcast %11 : vector<32x1xf32> to vector<32x128xf32>
    %13 = arith.addf %10, %12 : vector<32x128xf32>
    %cst_11 = arith.constant 0.000000e+00 : f32
    %14 = vector.broadcast %cst_11 : f32 to vector<32x128xf32>
    %15 = arith.maximumf %13, %14 : vector<32x128xf32>
    %c0_12 = arith.constant 0 : index
    %c0_13 = arith.constant 0 : index
    %16 = vector.load %arg7[%c0_12, %c0_13] : memref<16x32xbf16, #tpu.memory_space<vmem>>, vector<16x32xbf16>
    %17 = arith.truncf %15 : vector<32x128xf32> to vector<32x128xbf16>
    %cst_14 = arith.constant dense<0.000000e+00> : vector<16x128xf32>
    %18 = tpu.matmul %16, %17, %cst_14 {dimension_numbers = #tpu.dot_dimension_numbers<[1], [0], [0], [1], [0, 0, 1, 1], [], []>} : vector<16x32xbf16>, vector<32x128xbf16>, vector<16x128xf32> -> vector<16x128xf32>
    %c0_15 = arith.constant 0 : index
    %c0_16 = arith.constant 0 : index
    %19 = vector.load %arg8[%c0_15, %c0_16] : memref<16x1xf32, #tpu.memory_space<vmem>>, vector<16x1xf32>
    %20 = vector.broadcast %19 : vector<16x1xf32> to vector<16x128xf32>
    %21 = arith.addf %18, %20 : vector<16x128xf32>
    %22 = vector.extract_strided_slice %21 {offsets = [0, 0], sizes = [8, 128], strides = [1, 1]} : vector<16x128xf32> to vector<8x128xf32>
    %23 = vector.extract_strided_slice %21 {offsets = [8, 0], sizes = [8, 128], strides = [1, 1]} : vector<16x128xf32> to vector<8x128xf32>
    %cst_17 = arith.constant 5.000000e-01 : f32
    %24 = vector.broadcast %cst_17 : f32 to vector<8x128xf32>
    %25 = arith.mulf %24, %23 : vector<8x128xf32>
    %26 = math.exp %25 : vector<8x128xf32>
    %c0_18 = arith.constant 0 : index
    %c0_19 = arith.constant 0 : index
    %27 = vector.load %arg2[%c0_18, %c0_19] : memref<8x128xf32, #tpu.memory_space<vmem>>, vector<8x128xf32>
    %28 = arith.mulf %27, %26 : vector<8x128xf32>
    %29 = arith.addf %22, %28 : vector<8x128xf32>
    %c0_20 = arith.constant 0 : index
    %c0_21 = arith.constant 0 : index
    %30 = vector.load %arg9[%c0_20, %c0_21] : memref<32x8xbf16, #tpu.memory_space<vmem>>, vector<32x8xbf16>
    %31 = arith.truncf %29 : vector<8x128xf32> to vector<8x128xbf16>
    %cst_22 = arith.constant dense<0.000000e+00> : vector<32x128xf32>
    %32 = tpu.matmul %30, %31, %cst_22 {dimension_numbers = #tpu.dot_dimension_numbers<[1], [0], [0], [1], [0, 0, 1, 1], [], []>} : vector<32x8xbf16>, vector<8x128xbf16>, vector<32x128xf32> -> vector<32x128xf32>
    %c0_23 = arith.constant 0 : index
    %c0_24 = arith.constant 0 : index
    %33 = vector.load %arg10[%c0_23, %c0_24] : memref<32x1xf32, #tpu.memory_space<vmem>>, vector<32x1xf32>
    %34 = vector.broadcast %33 : vector<32x1xf32> to vector<32x128xf32>
    %35 = arith.addf %32, %34 : vector<32x128xf32>
    %cst_25 = arith.constant 0.000000e+00 : f32
    %36 = vector.broadcast %cst_25 : f32 to vector<32x128xf32>
    %37 = arith.maximumf %35, %36 : vector<32x128xf32>
    %c0_26 = arith.constant 0 : index
    %c0_27 = arith.constant 0 : index
    %38 = vector.load %arg11[%c0_26, %c0_27] : memref<32x32xbf16, #tpu.memory_space<vmem>>, vector<32x32xbf16>
    %39 = arith.truncf %37 : vector<32x128xf32> to vector<32x128xbf16>
    %cst_28 = arith.constant dense<0.000000e+00> : vector<32x128xf32>
    %40 = tpu.matmul %38, %39, %cst_28 {dimension_numbers = #tpu.dot_dimension_numbers<[1], [0], [0], [1], [0, 0, 1, 1], [], []>} : vector<32x32xbf16>, vector<32x128xbf16>, vector<32x128xf32> -> vector<32x128xf32>
    %c0_29 = arith.constant 0 : index
    %c0_30 = arith.constant 0 : index
    %41 = vector.load %arg12[%c0_29, %c0_30] : memref<32x1xf32, #tpu.memory_space<vmem>>, vector<32x1xf32>
    %42 = vector.broadcast %41 : vector<32x1xf32> to vector<32x128xf32>
    %43 = arith.addf %40, %42 : vector<32x128xf32>
    %cst_31 = arith.constant 0.000000e+00 : f32
    %44 = vector.broadcast %cst_31 : f32 to vector<32x128xf32>
    %45 = arith.maximumf %43, %44 : vector<32x128xf32>
    %c0_32 = arith.constant 0 : index
    %c0_33 = arith.constant 0 : index
    %46 = vector.load %arg13[%c0_32, %c0_33] : memref<16x32xbf16, #tpu.memory_space<vmem>>, vector<16x32xbf16>
    %47 = arith.truncf %45 : vector<32x128xf32> to vector<32x128xbf16>
    %cst_34 = arith.constant dense<0.000000e+00> : vector<16x128xf32>
    %48 = tpu.matmul %46, %47, %cst_34 {dimension_numbers = #tpu.dot_dimension_numbers<[1], [0], [0], [1], [0, 0, 1, 1], [], []>} : vector<16x32xbf16>, vector<32x128xbf16>, vector<16x128xf32> -> vector<16x128xf32>
    %c0_35 = arith.constant 0 : index
    %c0_36 = arith.constant 0 : index
    %49 = vector.load %arg14[%c0_35, %c0_36] : memref<16x1xf32, #tpu.memory_space<vmem>>, vector<16x1xf32>
    %50 = vector.broadcast %49 : vector<16x1xf32> to vector<16x128xf32>
    %51 = arith.addf %48, %50 : vector<16x128xf32>
    %c0_37 = arith.constant 0 : index
    %c0_38 = arith.constant 0 : index
    %52 = vector.load %arg15[%c0_37, %c0_38] : memref<16x128xf32, #tpu.memory_space<vmem>>, vector<16x128xf32>
    tpu.vector_store %arg15[%c0_37, %c0_38], %51 {strides = array<i32>} : memref<16x128xf32, #tpu.memory_space<vmem>>, vector<16x128xf32>,
    %c0_39 = arith.constant 0 : index
    %c0_40 = arith.constant 0 : index
    %53 = vector.load %arg16[%c0_39, %c0_40] : memref<16x128xf32, #tpu.memory_space<vmem>>, vector<16x128xf32>
    tpu.vector_store %arg16[%c0_39, %c0_40], %21 {strides = array<i32>} : memref<16x128xf32, #tpu.memory_space<vmem>>, vector<16x128xf32>,
    return
  }
  func.func @transform_0(%arg0: i32) -> (i32, i32) {
    %c0_i32 = arith.constant 0 : i32
    %c0_i32_0 = arith.constant 0 : i32
    return %c0_i32, %arg0 : i32, i32
  }
  func.func @transform_1(%arg0: i32) -> (i32, i32) {
    %c0_i32 = arith.constant 0 : i32
    %c0_i32_0 = arith.constant 0 : i32
    return %c0_i32, %arg0 : i32, i32
  }
  func.func @transform_2(%arg0: i32) -> (i32, i32) {
    %c0_i32 = arith.constant 0 : i32
    %c0_i32_0 = arith.constant 0 : i32
    %c0_i32_1 = arith.constant 0 : i32
    return %c0_i32, %c0_i32_0 : i32, i32
  }
  func.func @transform_3(%arg0: i32) -> (i32, i32) {
    %c0_i32 = arith.constant 0 : i32
    %c0_i32_0 = arith.constant 0 : i32
    %c0_i32_1 = arith.constant 0 : i32
    return %c0_i32, %c0_i32_0 : i32, i32
  }
  func.func @transform_4(%arg0: i32) -> (i32, i32) {
    %c0_i32 = arith.constant 0 : i32
    %c0_i32_0 = arith.constant 0 : i32
    %c0_i32_1 = arith.constant 0 : i32
    return %c0_i32, %c0_i32_0 : i32, i32
  }
  func.func @transform_5(%arg0: i32) -> (i32, i32) {
    %c0_i32 = arith.constant 0 : i32
    %c0_i32_0 = arith.constant 0 : i32
    %c0_i32_1 = arith.constant 0 : i32
    return %c0_i32, %c0_i32_0 : i32, i32
  }
  func.func @transform_6(%arg0: i32) -> (i32, i32) {
    %c0_i32 = arith.constant 0 : i32
    %c0_i32_0 = arith.constant 0 : i32
    %c0_i32_1 = arith.constant 0 : i32
    return %c0_i32, %c0_i32_0 : i32, i32
  }
  func.func @transform_7(%arg0: i32) -> (i32, i32) {
    %c0_i32 = arith.constant 0 : i32
    %c0_i32_0 = arith.constant 0 : i32
    %c0_i32_1 = arith.constant 0 : i32
    return %c0_i32, %c0_i32_0 : i32, i32
  }
  func.func @transform_8(%arg0: i32) -> (i32, i32) {
    %c0_i32 = arith.constant 0 : i32
    %c0_i32_0 = arith.constant 0 : i32
    %c0_i32_1 = arith.constant 0 : i32
    return %c0_i32, %c0_i32_0 : i32, i32
  }
  func.func @transform_9(%arg0: i32) -> (i32, i32) {
    %c0_i32 = arith.constant 0 : i32
    %c0_i32_0 = arith.constant 0 : i32
    %c0_i32_1 = arith.constant 0 : i32
    return %c0_i32, %c0_i32_0 : i32, i32
  }
  func.func @transform_10(%arg0: i32) -> (i32, i32) {
    %c0_i32 = arith.constant 0 : i32
    %c0_i32_0 = arith.constant 0 : i32
    %c0_i32_1 = arith.constant 0 : i32
    return %c0_i32, %c0_i32_0 : i32, i32
  }
  func.func @transform_11(%arg0: i32) -> (i32, i32) {
    %c0_i32 = arith.constant 0 : i32
    %c0_i32_0 = arith.constant 0 : i32
    %c0_i32_1 = arith.constant 0 : i32
    return %c0_i32, %c0_i32_0 : i32, i32
  }
  func.func @transform_12(%arg0: i32) -> (i32, i32) {
    %c0_i32 = arith.constant 0 : i32
    %c0_i32_0 = arith.constant 0 : i32
    %c0_i32_1 = arith.constant 0 : i32
    return %c0_i32, %c0_i32_0 : i32, i32
  }
  func.func @transform_13(%arg0: i32) -> (i32, i32) {
    %c0_i32 = arith.constant 0 : i32
    %c0_i32_0 = arith.constant 0 : i32
    %c0_i32_1 = arith.constant 0 : i32
    return %c0_i32, %c0_i32_0 : i32, i32
  }
  func.func @transform_14(%arg0: i32) -> (i32, i32) {
    %c0_i32 = arith.constant 0 : i32
    %c0_i32_0 = arith.constant 0 : i32
    return %c0_i32, %arg0 : i32, i32
  }
  func.func @transform_15(%arg0: i32) -> (i32, i32) {
    %c0_i32 = arith.constant 0 : i32
    %c0_i32_0 = arith.constant 0 : i32
    return %c0_i32, %arg0 : i32, i32
  }
}

</mosaic_0001>

<bundles_post_ra>
// kernel: beta_vae_forward.1
= control target key start
LH: loop header
LB: loop body
LE: loop exit
PB: predicated region body
PF: predicated region fallthrough
CT: control target
= control target key end

     0   :  { %s1342_s18 = smov 0   ;;  %s1344_s19 = smov 0   ;;  %s1513_s0 = inlined_call_operand.vmem [shape: bf16[16,256], index: 0, kind: input, shape index: {}]   ;;  %s1514_s1 = inlined_call_operand.vmem [shape: f32[8,256], index: 1, kind: input, shape index: {}]   ;;  %s1515_s2 = inlined_call_operand.vmem [shape: bf16[32,16], index: 2, kind: input, shape index: {}]   ;;  %s1516_s3 = inlined_call_operand.vmem [shape: f32[32,1], index: 3, kind: input, shape index: {}]   ;;  %s1517_s4 = inlined_call_operand.vmem [shape: bf16[32,32], index: 4, kind: input, shape index: {}]   ;;  %s1518_s5 = inlined_call_operand.vmem [shape: f32[32,1], index: 5, kind: input, shape index: {}]   ;;  %s1519_s6 = inlined_call_operand.vmem [shape: bf16[16,32], index: 6, kind: input, shape index: {}]   ;;  %s1520_s7 = inlined_call_operand.vmem [shape: f32[16,1], index: 7, kind: input, shape index: {}]   ;;  %s1521_s8 = inlined_call_operand.vmem [shape: bf16[32,8], index: 8, kind: input, shape index: {}]   ;;  %s1522_s9 = inlined_call_operand.vmem [shape: f32[32,1], index: 9, kind: input, shape index: {}]   ;;  %s1523_s10 = inlined_call_operand.vmem [shape: bf16[32,32], index: 10, kind: input, shape index: {}]   ;;  %s1524_s11 = inlined_call_operand.vmem [shape: f32[32,1], index: 11, kind: input, shape index: {}]   ;;  %s1525_s12 = inlined_call_operand.vmem [shape: bf16[16,32], index: 12, kind: input, shape index: {}]   ;;  %s1526_s13 = inlined_call_operand.vmem [shape: f32[16,1], index: 13, kind: input, shape index: {}]   ;;  %s1527_s14 = inlined_call_operand.vmem [shape: f32[16,256], index: 14, kind: output, shape index: {0}]   ;;  %s1528_s15 = inlined_call_operand.vmem [shape: f32[16,256], index: 15, kind: output, shape index: {1}]  }
   0x1   :  { %s1346_s20 = smov 0  }
   0x2 LB: > { %s1355_s21 = sadd.s32 4294967295, %s1259_s20   ;;  %s1357_s22 = sadd.s32 1, %s1259_s20   ;;  %s1259_s20 = sphi %s1346_s20, %s1536_s20   ;;  %s1255_s19 = sphi %s1344_s19, %s1535_s19   ;;  %s1251_s18 = sphi %s1342_s18, %s1534_s18  }
   0x3   : > { %s30_s23 = ssub.s32 %s1259_s20, %s1357_s22  ;;  %s33_s24 = sadd.s32 1, %s1255_s19 }
   0x4   : > { %p31_p0 = scmp.eq.s32.totalorder %s30_s23, 0  ;;  %p40_p1 = scmp.ne.s32.totalorder %s1255_s19, %s1251_s18 }
   0x5   : > { %p41_p2 = scmp.eq.s32.totalorder %s1259_s20, 0  ;;  %p348_p3 = scmp.eq.s32.totalorder %s1355_s21, 1 }
   0x6   : > { %s1365_s25 = scalar_select %p31_p0, %s1255_s19, %s33_s24  }
   0x7   : > { %p42_p4 = por %p41_p2, %p40_p1  ;;  %p1367_p5 = por %p348_p3, %p40_p1 }
   0x8   : > { %1530 = sst [smem:[#allocation5_spill]] %s1365_s25  ;;  %p1126_p6 = scmp.ge.s32.totalorder %s1259_s20, 2 }
   0xa   : > { %432 = sbr.rel (%p1126_p6) target bundleno = 21 (0x15), region = 64 }
   0xf   : > { %435 = sbr.rel (!%p42_p4) target bundleno = 21 (0x15), region = 68  ;;  %s437_s27 = sand.u32 (%p42_p4), 1, %s1255_s19  }
  0x10   : > { %s1128_s28 = sshll.u32 (%p42_p4), %s1259_s20, 2  ;;  %s1127_s29 = sshll.u32 (%p42_p4), %s437_s27, 3 }
  0x11   : > { %s441_s17 = scalar_lea.vmem (%p42_p4), %s1513_s0, %s1128_s28  ;;  %s439_s23 = scalar_lea.vmem (%p42_p4), [#allocation2], %s1127_s29 }
  0x12   : > { %v458_v0 = vld [vmem:[%s441_s17] sm:$0xf] (%p42_p4)  ;;  %v460_v1 = vld [vmem:[%s441_s17 + $0x8] sm:$0xf] (%p42_p4) }
  0x13   : > { %459 = vst [vmem:[%s439_s23] sm:$0xf] (%p42_p4), %v458_v0 }
  0x14   : > { %461 = vst [vmem:[%s439_s23 + $0x4] sm:$0xf] %v460_v1 }
  0x15 PF: > { %p1129_p7 = scmp.ge.s32.totalorder %s1259_s20, 1  ;;  %p495_p8 = scmp.lt.s32.totalorder %s1259_s20, 3 }
  0x17   : > { %p496_p9 = pnand %p1129_p7, %p495_p8 }
  0x18   : > { %s1529_s28 = sand.u32 (!%p496_p9), 1, %s1251_s18   ;;  %s1532_s30 = sand.u32 (!%p496_p9), 1, %s1251_s18  }
  0x19   : > { %499 = sbr.rel (%p496_p9) target bundleno = 997 (0x3e5), region = 113  ;;  %s1130_s29 = sshll.u32 (!%p496_p9), %s1529_s28, 3 }
  0x1a   : > { %s504_s20 = scalar_lea.vmem (!%p496_p9), [#allocation2], %s1130_s29  ;;  %s1458_s29 = sshll.u32 (!%p496_p9), %s1532_s30, 4 }
  0x1b   : > { %p556_p10 = scmp.lt.s32.totalorder (!%p496_p9), %s1355_s21, 1  ;;  %s549_s24 = scalar_lea.vmem (!%p496_p9), [#allocation3], %s1458_s29 }
  0x1e   : > { %v569_v2 = vld [vmem:[%s1516_s3 + $0x10] sm:$0xff]  ;;  %v567_v3 = vld [vmem:[%s1516_s3] sm:$0xff]  ;;  %v1261_v4 = vmov 0   ;;  %vm607_vm0 = vcmask 130048   ;;  %v570_v7 = vld [vmem:[%s1516_s3 + $0x18] sm:$0xff]  ;;  %vm677_vm1 = vcmask 261120  }
  0x1f   : > { %1233 = vset.pattern.permute.xlu1 %v1261_v4  ;;  %1232 = vset.pattern.permute.xlu0 %v1261_v4  ;;  %v1194_v5 = vld [vmem:[%s504_s20] sm:$0xff]  ;;  %v758_v13 = vld [vmem:[%s1522_s9 + $0x10] sm:$0xff]  ;;  %v833_v16 = vld [vmem:[%s1524_s11 + $0x18] sm:$0xff]  ;;  %s1461_s20 = scalar_lea.vmem [#allocation4], %s1458_s29  ;;  %vm797_vm2 = vcmask 1043456   ;;  %vm790_vm3 = vcmask 64512  }
  0x20   : > { %583 = vperm.xlu0 %1232, %v569_v2   ;;  %573 = vperm.xlu1 %1233, %v567_v3   ;;  %v1195_v6 = vld [vmem:[%s1515_s2] sm:$0xff]  ;;  %v568_v8 = vld [vmem:[%s1516_s3 + $0x8] sm:$0xff]  ;;  %v645_v21 = vld [vmem:[%s1518_s5 + $0x10] sm:$0xff]  ;;  %s557_s16 = scalar_select %p556_p10, %s1355_s21, 1 }
  0x21   : > { %1234 = vset.pattern.permute.xlu2 %v1261_v4  ;;  %621 = vmatpush.bf16.msra.mxu0 %v1194_v5  ;;  %v643_v9 = vld [vmem:[%s1518_s5] sm:$0xff]  ;;  %v644_v10 = vld [vmem:[%s1518_s5 + $0x8] sm:$0xff]  ;;  %v646_v26 = vld [vmem:[%s1518_s5 + $0x18] sm:$0xff]  ;;  %s1190_s27 = sshll.u32 (%p1367_p5), %s1355_s21, 3 }
  0x22   : > { %v1196_v11 = vld [vmem:[%s1515_s2 + $0x8] sm:$0xff]  ;;  %v711_v12 = vld [vmem:[%s1520_s7] sm:$0xff]  ;;  %659 = vperm.xlu2 %1234, %v645_v21   ;;  %v759_v42 = vld [vmem:[%s1522_s9 + $0x18] sm:$0xff]  ;;  %s1133_s18 = sshll.u32 %s557_s16, 3 }
  0x23   : > { %v756_v14 = vld [vmem:[%s1522_s9] sm:$0xff]  ;;  %v757_v15 = vld [vmem:[%s1522_s9 + $0x8] sm:$0xff]  ;;  %v832_v43 = vld [vmem:[%s1524_s11 + $0x10] sm:$0xff]  ;;  %s559_s23 = scalar_lea.vmem %s1514_s1, %s1133_s18  ;;  %s947_s18 = scalar_lea.vmem (%p1367_p5), %s1527_s14, %s1190_s27 }
  0x24   : > { %1146 = vmatmul.msk.bf16.vlgmr.msra.gmra.mxu0 %vm607_vm0, %v1195_v6  ;;  %v830_v17 = vld [vmem:[%s1524_s11] sm:$0xff]  ;;  %v898_v19 = vld [vmem:[%s1526_s13 + $0x8] sm:$0xff] }
  0x25   : > { %v897_v18 = vld [vmem:[%s1526_s13] sm:$0xff]  ;;  %v712_v36 = vld [vmem:[%s1520_s7 + $0x8] sm:$0xff] }
  0x26   : > { %v1197_v41 = vld [vmem:[%s1517_s4] sm:$0xff]  ;;  %v1198_v44 = vld [vmem:[%s1517_s4 + $0x8] sm:$0xff] }
  0x27   : > { %v831_v45 = vld [vmem:[%s1524_s11 + $0x8] sm:$0xff]  ;;  %v1199_v0 = vld [vmem:[%s1519_s6] sm:$0xff] }
  0x28   : > { %588 = vperm.xlu0 %1232, %v570_v7   ;;  %578 = vperm.xlu1 %1233, %v568_v8  }
  0x2a   : > { %664 = vperm.xlu2 %1234, %v646_v26  }
  0x30   : > { %649 = vperm.xlu0 %1232, %v643_v9   ;;  %654 = vperm.xlu1 %1233, %v644_v10   ;;  %v748_v9 = vld [vmem:[%s559_s23] sm:$0xff] }
  0x32   : > { %720 = vperm.xlu2 %1234, %v712_v36   ;;  %v1203_v36 = vld [vmem:[%s1523_s10 + $0x8] sm:$0xff] }
  0x34   : > { %1147 = vmatmul.msk.bf16.gmra.mxu0 %vm607_vm0, %v1196_v11 }
  0x38   : > { %715 = vperm.xlu0 %1232, %v711_v12   ;;  %772 = vperm.xlu1 %1233, %v758_v13  }
  0x3a   : > { %777 = vperm.xlu2 %1234, %v759_v42  }
  0x40   : > { %762 = vperm.xlu0 %1232, %v756_v14   ;;  %767 = vperm.xlu1 %1233, %v757_v15   ;;  %v1200_v15 = vld [vmem:[%s1521_s8] sm:$0xff] }
  0x42   : > { %846 = vperm.xlu2 %1234, %v832_v43  }
  0x48   : > { %851 = vperm.xlu0 %1232, %v833_v16   ;;  %836 = vperm.xlu1 %1233, %v830_v17   ;;  %v1201_v16 = vld [vmem:[%s1521_s8 + $0x8] sm:$0xff] }
  0x4a   : > { %841 = vperm.xlu2 %1234, %v831_v45  }
  0x50   : > { %901 = vperm.xlu0 %1232, %v897_v18   ;;  %906 = vperm.xlu1 %1233, %v898_v19  }
  0x7c   : > { %v660_v48 = vpop.permute.xlu2 %659 }
  0x84   : > { %v665_v52 = vpop.permute.xlu2 %664 }
  0x8c   : > { %v721_v4 = vpop.permute.xlu2 %720 }
  0x92   : > { %v584_v23 = vpop.permute.xlu0 %583  ;;  %v574_v24 = vpop.permute.xlu1 %573 }
  0x9a   : > { %v589_v27 = vpop.permute.xlu0 %588  ;;  %v579_v29 = vpop.permute.xlu1 %578 }
  0xa1   : > { %v623_v20 = vpop.f32.mrf.mxu0 }
  0xa2   : > { %v624_v33 = vadd.f32 %v623_v20, %v574_v24  ;;  %v655_v50 = vpop.permute.xlu1 %654  ;;  %v650_v56 = vpop.permute.xlu0 %649 }
  0xa4   : > { %v633_v39 = vmax.f32 %v624_v33, 0.0 }
  0xa9   : > { %v625_v22 = vpop.f32.mrf.mxu0 }
  0xaa   : > { %v626_v31 = vadd.f32 %v625_v22, %v579_v29  ;;  %v716_v1 = vpop.permute.xlu0 %715  ;;  %v773_v19 = vpop.permute.xlu1 %772 }
  0xac   : > { %v634_v37 = vmax.f32 %v626_v31, 0.0 }
  0xae   : > { %v641_v40 = vpack.c.bf16 %v634_v37, %v633_v39 }
  0xb1   : > { %v628_v25 = vpop.f32.mrf.mxu0 }
  0xb2   : > { %v629_v28 = vadd.f32 %v628_v25, %v584_v23  ;;  %v768_v21 = vpop.permute.xlu1 %767  ;;  %v778_v23 = vpop.permute.xlu2 %777 }
  0xb4   : > { %v635_v34 = vmax.f32 %v629_v28, 0.0 }
  0xb9   : > { %v630_v30 = vpop.f32.mrf.mxu0 }
  0xba   : > { %v631_v32 = vadd.f32 %v630_v30, %v589_v27  ;;  %v763_v27 = vpop.permute.xlu0 %762  ;;  %v847_v37 = vpop.permute.xlu2 %846 }
  0xbc   : > { %v636_v35 = vmax.f32 %v631_v32, 0.0 }
  0xbe   : > { %v642_v38 = vpack.c.bf16 %v636_v35, %v635_v34  ;;  %v1202_v35 = vld [vmem:[%s1523_s10] sm:$0xff] }
  0xc0   : > { %690 = vmatpush.bf16.msra.mxu1 %v642_v38 }
  0xc4   : > { %691 = vmatpush.bf16.msra.mxu1 %v641_v40  ;;  %v852_v40 = vpop.permute.xlu0 %851 }
  0xc7   : > { %1156 = vmatmul.msk.bf16.vlgmr.msra.gmra.mxu1 %vm677_vm1, %v1197_v41  ;;  %v842_v41 = vpop.permute.xlu2 %841 }
  0xd7   : > { %1157 = vmatmul.msk.bf16.gmra.mxu1 %vm677_vm1, %v1198_v44 }
 0x144   : > { %v693_v46 = vpop.f32.mrf.mxu1 }
 0x145   : > { %v694_v57 = vadd.f32 %v693_v46, %v650_v56  ;;  %v902_v56 = vpop.permute.xlu0 %901 }
 0x147   : > { %v703_v62 = vmax.f32 %v694_v57, 0.0 }
 0x14c   : > { %v695_v47 = vpop.f32.mrf.mxu1 }
 0x14d   : > { %v696_v54 = vadd.f32 %v695_v47, %v655_v50  ;;  %v837_v47 = vpop.permute.xlu1 %836 }
 0x14f   : > { %v704_v60 = vmax.f32 %v696_v54, 0.0 }
 0x151   : > { %v709_v63 = vpack.c.bf16 %v704_v60, %v703_v62 }
 0x154   : > { %v698_v49 = vpop.f32.mrf.mxu1 }
 0x155   : > { %v699_v51 = vadd.f32 %v698_v49, %v660_v48 }
 0x157   : > { %v705_v58 = vmax.f32 %v699_v51, 0.0 }
 0x15c   : > { %v700_v53 = vpop.f32.mrf.mxu1 }
 0x15d   : > { %v701_v55 = vadd.f32 %v700_v53, %v665_v52 }
 0x15f   : > { %v706_v59 = vmax.f32 %v701_v55, 0.0  ;;  %v1204_v55 = vld [vmem:[%s1525_s12] sm:$0xff] }
 0x161   : > { %v710_v61 = vpack.c.bf16 %v706_v59, %v705_v58  ;;  %v907_v59 = vpop.permute.xlu1 %906 }
 0x163   : > { %737 = vmatpush.bf16.msra.mxu2 %v710_v61 }
 0x167   : > { %738 = vmatpush.bf16.msra.mxu2 %v709_v63 }
 0x16a   : > { %1162 = vmatmul.msk.bf16.vlgmr.msra.gmra.mxu2 %vm677_vm1, %v1199_v0 }
 0x1ed   : > { %v740_v2 = vpop.f32.mrf.mxu2 }
 0x1ee   : > { %v741_v3 = vadd.f32 %v740_v2, %v716_v1 }
 0x1f0   : > { %933 = vst [vmem:[%s1461_s20] sm:$0xff] %v741_v3 }
 0x1f5   : > { %v742_v5 = vpop.f32.mrf.mxu2 }
 0x1f6   : > { %v743_v6 = vadd.f32 %v742_v5, %v721_v4 }
 0x1f8   : > { %v745_v7 = vmul.f32 0.5, %v743_v6  ;;  %934 = vst [vmem:[%s1461_s20 + $0x8] sm:$0xff] %v743_v6 }
 0x1fa   : > { %v746_v8 = vmul.f32 1.442695, %v745_v7 }
 0x1fc   : > { %1235 = vpow2.f32 %v746_v8 }
 0x202   : > { %v1236_v10 = vpop.eup %1235 }
 0x203   : > { %v749_v11 = vmul.f32 %v1236_v10, %v748_v9 }
 0x205   : > { %v750_v12 = vadd.f32 %v749_v11, %v741_v3 }
 0x207   : > { %v755_v13 = vpack.c.bf16 %v750_v12, %v750_v12 }
 0x209   : > { %v799_v14 = vsel %vm797_vm2, %v755_v13, 0 }
 0x20a   : > { %808 = vmatpush.bf16.msra.mxu3 %v799_v14 }
 0x20d   : > { %1171 = vmatmul.msk.bf16.vlgmr.msra.gmra.mxu3 %vm790_vm3, %v1200_v15 }
 0x21d   : > { %1172 = vmatmul.msk.bf16.gmra.mxu3 %vm790_vm3, %v1201_v16 }
 0x290   : > { %v810_v17 = vpop.f32.mrf.mxu3 }
 0x291   : > { %v811_v28 = vadd.f32 %v810_v17, %v763_v27 }
 0x293   : > { %v820_v33 = vmax.f32 %v811_v28, 0.0 }
 0x298   : > { %v812_v18 = vpop.f32.mrf.mxu3 }
 0x299   : > { %v813_v25 = vadd.f32 %v812_v18, %v768_v21 }
 0x29b   : > { %v821_v31 = vmax.f32 %v813_v25, 0.0 }
 0x29d   : > { %v828_v34 = vpack.c.bf16 %v821_v31, %v820_v33 }
 0x2a0   : > { %v815_v20 = vpop.f32.mrf.mxu3 }
 0x2a1   : > { %v816_v22 = vadd.f32 %v815_v20, %v773_v19 }
 0x2a3   : > { %v822_v29 = vmax.f32 %v816_v22, 0.0 }
 0x2a8   : > { %v817_v24 = vpop.f32.mrf.mxu3 }
 0x2a9   : > { %v818_v26 = vadd.f32 %v817_v24, %v778_v23 }
 0x2ab   : > { %v823_v30 = vmax.f32 %v818_v26, 0.0 }
 0x2ad   : > { %v829_v32 = vpack.c.bf16 %v823_v30, %v822_v29 }
 0x2af   : > { %876 = vmatpush.bf16.msrb.mxu2 %v829_v32  ;;  %1205 = vmatpush.bf16.msrb.mxu3 %v829_v32 }
 0x2b3   : > { %877 = vmatpush.bf16.msrb.mxu2 %v828_v34  ;;  %1206 = vmatpush.bf16.msrb.mxu3 %v828_v34 }
 0x2b6   : > { %1181 = vmatmul.msk.bf16.vlgmr.msrb.gmra.mxu2 %vm677_vm1, %v1202_v35  ;;  %1182 = vmatmul.msk.bf16.vlgmr.msrb.gmra.mxu3 %vm677_vm1, %v1203_v36 }
 0x339   : > { %v879_v38 = vpop.f32.mrf.mxu2  ;;  %v884_v39 = vpop.f32.mrf.mxu3 }
 0x33a   : > { %v885_v42 = vadd.f32 %v884_v39, %v847_v37  ;;  %v880_v48 = vadd.f32 %v879_v38, %v837_v47 }
 0x33c   : > { %v891_v49 = vmax.f32 %v885_v42, 0.0  ;;  %v889_v53 = vmax.f32 %v880_v48, 0.0 }
 0x341   : > { %v881_v43 = vpop.f32.mrf.mxu2  ;;  %v886_v44 = vpop.f32.mrf.mxu3 }
 0x342   : > { %v882_v45 = vadd.f32 %v881_v43, %v842_v41  ;;  %v887_v46 = vadd.f32 %v886_v44, %v852_v40 }
 0x344   : > { %v892_v50 = vmax.f32 %v887_v46, 0.0  ;;  %v890_v51 = vmax.f32 %v882_v45, 0.0 }
 0x346   : > { %v896_v52 = vpack.c.bf16 %v892_v50, %v891_v49  ;;  %v895_v54 = vpack.c.bf16 %v890_v51, %v889_v53 }
 0x348   : > { %923 = vmatpush.bf16.msrb.mxu0 %v896_v52 }
 0x34c   : > { %924 = vmatpush.bf16.msrb.mxu0 %v895_v54 }
 0x34f   : > { %1187 = vmatmul.msk.bf16.vlgmr.msrb.gmra.mxu0 %vm677_vm1, %v1204_v55 }
 0x3cc   : > { %v926_v57 = vpop.f32.mrf.mxu0 }
 0x3cd   : > { %v927_v58 = vadd.f32 %v926_v57, %v902_v56 }
 0x3cf   : > { %931 = vst [vmem:[%s549_s24] sm:$0xff] %v927_v58 }
 0x3d3   : > { %945 = sbr.rel (!%p1367_p5) target bundleno = 992 (0x3e0), region = 121 }
 0x3d4   : > { %v928_v60 = vpop.f32.mrf.mxu0 }
 0x3d5   : > { %v929_v61 = vadd.f32 %v928_v60, %v907_v59 }
 0x3d6   : > { %v978_v62 = vld [vmem:[%s549_s24] sm:$0xff] (%p1367_p5) }
 0x3d7   : > { %932 = vst [vmem:[%s549_s24 + $0x8] sm:$0xff] %v929_v61 }
 0x3d8   : > { %979 = vst [vmem:[%s947_s18] sm:$0xff] %v978_v62 }
 0x3de   : > { %v980_v63 = vld [vmem:[%s549_s24 + $0x8] sm:$0xff] }
 0x3df   : > { %981 = vst [vmem:[%s947_s18 + $0x10] sm:$0xff] %v980_v63 }
 0x3e0 PF: > { %987 = sbr.rel (!%p1367_p5) target bundleno = 997 (0x3e5), region = 159  ;;  %s1191_s29 = sshll.u32 (%p1367_p5), %s1355_s21, 3  ;;  %v1020_v0 = vld [vmem:[%s1461_s20] sm:$0xff] (%p1367_p5)  ;;  %v1022_v1 = vld [vmem:[%s1461_s20 + $0x8] sm:$0xff] (%p1367_p5) }
 0x3e1   : > { %s989_s23 = scalar_lea.vmem (%p1367_p5), %s1528_s15, %s1191_s29 }
 0x3e2   : > { %1021 = vst [vmem:[%s989_s23] sm:$0xff] (%p1367_p5), %v1020_v0 }
 0x3e3   : > { %1023 = vst [vmem:[%s989_s23 + $0x10] sm:$0xff] (%p1367_p5), %v1022_v1 }
 0x3e5 PF: > { %s1533_s28 = sld [smem:[#allocation5_spill]]  ;;  %p23_p11 = scmp.ge.s32.totalorder %s1357_s22, 4  }
 0x3e6   : > { %s1534_s18 = smov %s1255_s19  ;;  %s1536_s20 = smov %s1357_s22 }
 0x3e7   :  { %25 = sbr.rel (!%p23_p11) target bundleno = 2 (0x2), region = 243 }
 0x3eb   : > { %s1535_s19 = smov %s1533_s28 }

</bundles_post_ra>
